<compile_context>
chip_gen: v7x
topology: tpu7x:2x2x1
jax: 0.10.0
libtpu: 0.0.40
codegen_flags: <defaults>
</compile_context>

<pallas_src>
import functools
import numpy as np
import jax
import jax.numpy as jnp
from jax import lax
from jax.experimental import pallas as pl
from jax.experimental.pallas import tpu as pltpu  # noqa: F401  (TPU backend assumed)

# ---------------- model hyper-parameters (args.*) ----------------
HIDDEN = 32          # args.hidden_size == all embed sizes
HEADS = 4            # args.head_num
DH = HIDDEN // HEADS
FFN_INNER = 64       # args.ffn_inner_hidden_size
OUT_PAD = 128        # lane-dense output slab width (real wh output = 2 columns)

# ---------------- packed weight-slab layout (static column offsets) ----------------
# wslab: (HIDDEN+1, 448); row HIDDEN is the packed bias row.
PROJ_OFF, PROJ_W = 0, 3 * HIDDEN                 # [sent_w | user_w | item_w]   (+bias row: [sent_b | 0 | 0])
ATT_OFF, ATT_W = 128, 2 * HEADS                  # [cl | cr]                    (128-aligned group start)
FFN_OFF, FFN_W = 256, FFN_INNER + OUT_PAD        # [w1 | wh_w_pad]              (+bias row: [b1 | b_fold])
WSLAB_ROWS, WSLAB_COLS = HIDDEN + 1, FFN_OFF + FFN_W
# wtall: (HEADS*HIDDEN, 160); cols 0:128 rows 0:64 = w2@wh (folded), cols 128:160 = stacked Wq_h@Wo_h.
MSTACK_OFF = 128
WTALL_ROWS, WTALL_COLS = HEADS * HIDDEN, MSTACK_OFF + HIDDEN


def _full_spec(shape):
    # whole-array block (no grid): block_shape == array shape, constant index map
    return pl.BlockSpec(shape, lambda: (0,) * len(shape))


# ------------- fused kernel: projections + ALLGAT + FFN + wh (lane-dense) -------------
def _fused_kernel(n_feat, n_sent, n_user, n_item,
                  xe_ref, adj_ref, wslab_ref, wtall_ref, o_ref):
    n_total = n_feat + n_sent + n_user + n_item
    q0, q1 = n_feat, n_feat + n_sent                       # sentence (query) row block

    # ---- prologue: ONE packed projection matmul + row-type select ----
    xe = xe_ref[...]                                                            # (N, H)
    proj = (jnp.dot(xe, wslab_ref[0:HIDDEN, PROJ_OFF:PROJ_OFF + PROJ_W],
                    preferred_element_type=jnp.float32)
            + wslab_ref[HIDDEN:HIDDEN + 1, PROJ_OFF:PROJ_OFF + PROJ_W])         # (N, 96)
    row = lax.broadcasted_iota(jnp.int32, (n_total, 1), 0)
    x = jnp.where(row < q0, xe,
        jnp.where(row < q1, proj[:, 0:HIDDEN],
        jnp.where(row < q1 + n_user, proj[:, HIDDEN:2 * HIDDEN],
                  proj[:, 2 * HIDDEN:3 * HIDDEN])))                             # (N, H)

    # ---- attention scores: queries = sentence rows, heads stacked on sublanes ----
    ap = jnp.dot(x, wslab_ref[0:HIDDEN, ATT_OFF:ATT_OFF + ATT_W],
                 preferred_element_type=jnp.float32)                            # (N, 2*HEADS)
    left_q = ap[q0:q1, 0:HEADS]                                                 # (Ns, HEADS)
    right_all = ap[:, HEADS:2 * HEADS]                                          # (N, HEADS)

    # stacked score pieces, row index = h*Ns + i (head-major, query i fastest)
    left_col = jnp.concatenate([left_q[:, h:h + 1] for h in range(HEADS)], axis=0)      # (HEADS*Ns, 1)
    right_stack = jnp.concatenate(
        [jnp.broadcast_to(jnp.transpose(right_all[:, h:h + 1]), (n_sent, n_total))
         for h in range(HEADS)], axis=0)                                                # (HEADS*Ns, N)
    adj_q = adj_ref[q0:q1, :]                                                           # (Ns, N)
    adj_big = jnp.concatenate([adj_q] * HEADS, axis=0)                                  # (HEADS*Ns, N)

    e = left_col + right_stack
    e = jnp.where(e > 0.0, e, 0.2 * e)                                          # LeakyReLU(0.2)
    logits = jnp.where(adj_big > 0.0, e * adj_big, -1e30)                       # weight+mask once
    m = jnp.max(logits, axis=1, keepdims=True)                                  # (HEADS*Ns, 1)
    p = jnp.exp(logits - m)                                                     # masked -> 0
    denom = jnp.sum(p, axis=1, keepdims=True)
    # guard: a row with no positive adjacency entry gets zero attention, not uniform
    inv = jnp.where(m > -1e29, pl.reciprocal(denom, approx=True), 0.0)          # EUP divide
    alpha = p * inv                                                             # (HEADS*Ns, N)

    # ---- value path: one context matmul for all heads, then one stacked M matmul ----
    ctx = jnp.dot(alpha, x, preferred_element_type=jnp.float32)                 # (HEADS*Ns, H)
    ctx_wide = jnp.concatenate([ctx[h * n_sent:(h + 1) * n_sent, :] for h in range(HEADS)],
                               axis=1)                                          # (Ns, HEADS*H)
    h_attn = jnp.dot(ctx_wide, wtall_ref[:, MSTACK_OFF:MSTACK_OFF + HIDDEN],
                     preferred_element_type=jnp.float32)                        # (Ns, H)

    h_res = x[q0:q1, :] + h_attn                                                # residual

    # ---- FFN + wh (second FFN layer folded through wh offline) ----
    ffnpack = (jnp.dot(h_res, wslab_ref[0:HIDDEN, FFN_OFF:FFN_OFF + FFN_W],
                       preferred_element_type=jnp.float32)
               + wslab_ref[HIDDEN:HIDDEN + 1, FFN_OFF:FFN_OFF + FFN_W])         # (Ns, 192)
    inner = jnp.maximum(ffnpack[:, 0:FFN_INNER], 0.0)                           # relu(h_res@w1 + b1)
    # out = h_res@wh + (relu(...)@w2 + b2)@wh + wh_b  (b2/wh_b folded into bias row)
    o_ref[...] = (ffnpack[:, FFN_INNER:FFN_INNER + OUT_PAD]
                  + jnp.dot(inner, wtall_ref[0:FFN_INNER, 0:OUT_PAD],
                            preferred_element_type=jnp.float32))                # (Ns, 128)


def graphx_forward(x_embed, adj, wslab, wtall, sizes):
    n_feat, n_sent, n_user, n_item = sizes
    kernel = functools.partial(_fused_kernel, n_feat, n_sent, n_user, n_item)
    args = (x_embed, adj, wslab, wtall)
    slab = pl.pallas_call(
        kernel,
        out_shape=jax.ShapeDtypeStruct((n_sent, OUT_PAD), jnp.float32),
        in_specs=[_full_spec(a.shape) for a in args],
        out_specs=_full_spec((n_sent, OUT_PAD)),
    )(*args)
    # wh(sentence hidden states) lives in the first 2 columns of the lane-dense slab
    return slab[:, :2]


def pack_graphx_params(sent_w, sent_b, user_w, item_w,
                       wq, al, ar, wo, w1, b1, w2, b2, wh_w, wh_b):
    """Offline parameter-only algebra + packing into the two kernel weight slabs."""
    cl_cols, cr_cols, m_blocks = [], [], []
    for h in range(HEADS):
        s = slice(h * DH, (h + 1) * DH)
        cl_cols.append(wq[:, s] @ al[s, :])          # left score:  x . (W^h a_l^h)
        cr_cols.append(wq[:, s] @ ar[s, :])          # right score: x . (W^h a_r^h)
        m_blocks.append(wq[:, s] @ wo[s, :])         # value path:  M_h = W^h @ Wo_h
    cl = jnp.concatenate(cl_cols, axis=1)            # (H, HEADS)
    cr = jnp.concatenate(cr_cols, axis=1)            # (H, HEADS)
    m_stack = jnp.concatenate(m_blocks, axis=0)      # (HEADS*H, H)

    wh_w_pad = jnp.zeros((HIDDEN, OUT_PAD), jnp.float32).at[:, :2].set(wh_w)
    wh_b_pad = jnp.zeros((1, OUT_PAD), jnp.float32).at[:, :2].set(wh_b)
    w2h = w2 @ wh_w_pad                              # (FFN_INNER, 128): w2 folded through wh
    b_fold = wh_b_pad + b2 @ wh_w_pad                # (1, 128)

    wslab = jnp.zeros((WSLAB_ROWS, WSLAB_COLS), jnp.float32)
    wslab = wslab.at[0:HIDDEN, 0:HIDDEN].set(sent_w)
    wslab = wslab.at[0:HIDDEN, HIDDEN:2 * HIDDEN].set(user_w)
    wslab = wslab.at[0:HIDDEN, 2 * HIDDEN:3 * HIDDEN].set(item_w)
    wslab = wslab.at[0:HIDDEN, ATT_OFF:ATT_OFF + HEADS].set(cl)
    wslab = wslab.at[0:HIDDEN, ATT_OFF + HEADS:ATT_OFF + 2 * HEADS].set(cr)
    wslab = wslab.at[0:HIDDEN, FFN_OFF:FFN_OFF + FFN_INNER].set(w1)
    wslab = wslab.at[0:HIDDEN, FFN_OFF + FFN_INNER:FFN_OFF + FFN_W].set(wh_w_pad)
    wslab = wslab.at[HIDDEN, 0:HIDDEN].set(sent_b[0])            # user/item proj have no bias
    wslab = wslab.at[HIDDEN, FFN_OFF:FFN_OFF + FFN_INNER].set(b1[0])
    wslab = wslab.at[HIDDEN, FFN_OFF + FFN_INNER:FFN_OFF + FFN_W].set(b_fold[0])

    wtall = jnp.zeros((WTALL_ROWS, WTALL_COLS), jnp.float32)
    wtall = wtall.at[0:FFN_INNER, 0:OUT_PAD].set(w2h)
    wtall = wtall.at[:, MSTACK_OFF:MSTACK_OFF + HIDDEN].set(m_stack)
    return wslab, wtall


if __name__ == "__main__":
    # ---------------- synthetic vocab / graph sizes ----------------
    user_num, item_num, feature_num, train_sent_num = 5, 6, 7, 10
    Nf, Ns, Nu, Ni = 4, 8, 2, 2          # nodes: features, sentences, users, items
    N = Nf + Ns + Nu + Ni

    key = jax.random.PRNGKey(0)
    ks = jax.random.split(key, 16)

    def init(k, shape, scale=0.1):
        return scale * jax.random.normal(k, shape, dtype=jnp.float32)

    # embedding tables (feature/sent tables stand in for the "pre-loaded" embeddings)
    user_embed_tbl = init(ks[0], (user_num, HIDDEN))
    item_embed_tbl = init(ks[1], (item_num, HIDDEN))
    feat_embed_tbl = init(ks[2], (feature_num, HIDDEN))
    sent_embed_tbl = init(ks[3], (train_sent_num, HIDDEN))

    # node ids (deterministic)
    fid = jnp.arange(Nf) % feature_num
    sid = jnp.arange(Ns) % train_sent_num
    uid = jnp.arange(Nu) % user_num
    iid = jnp.arange(Ni) % item_num

    # linear projection params (stored already transposed: x @ W + b)
    sent_w, sent_b = init(ks[4], (HIDDEN, HIDDEN)), init(ks[5], (1, HIDDEN))
    user_w = init(ks[6], (HIDDEN, HIDDEN))           # no bias
    item_w = init(ks[7], (HIDDEN, HIDDEN))           # no bias
    wh_w, wh_b = init(ks[8], (HIDDEN, 2)), init(ks[9], (1, 2))

    # GAT params
    wq = init(ks[10], (HIDDEN, HIDDEN))
    al = init(ks[11], (HIDDEN, 1))      # head h uses rows h*DH:(h+1)*DH
    ar = init(ks[12], (HIDDEN, 1))
    wo = init(ks[13], (HIDDEN, HIDDEN))
    w1 = init(ks[14], (HIDDEN, FFN_INNER))
    b1 = jnp.zeros((1, FFN_INNER), jnp.float32)
    w2 = init(ks[15], (FFN_INNER, HIDDEN))
    b2 = jnp.zeros((1, HIDDEN), jnp.float32)

    # one-time offline packing into the two kernel weight slabs
    wslab, wtall = pack_graphx_params(sent_w, sent_b, user_w, item_w,
                                      wq, al, ar, wo, w1, b1, w2, b2, wh_w, wh_b)
    wslab, wtall = jax.device_put(wslab), jax.device_put(wtall)

    # ---------------- dense adjacency with tffrac edge weights ----------------
    adj_np = np.zeros((N, N), np.float32)
    for s in range(Ns):                                # feature <-> sentence edges
        for f in range(Nf):
            if (s + f) % 2 == 0:
                w = 0.1 + 0.1 * ((s + f) % 5)
                adj_np[Nf + s, f] = w
                adj_np[f, Nf + s] = w
    for u in range(Nu):                                # feature <-> user edges
        for f in range(Nf):
            adj_np[Nf + Ns + u, f] = 0.3
            adj_np[f, Nf + Ns + u] = 0.3
    for i in range(Ni):                                # feature <-> item edges
        for f in range(Nf):
            adj_np[Nf + Ns + Nu + i, f] = 0.4
            adj_np[f, Nf + Ns + Nu + i] = 0.4
    adj_np += np.eye(N, dtype=np.float32)              # self loops keep softmax well-defined
    adj = jnp.asarray(adj_np)

    # ---------------- forward pass ----------------
    f_embed = jnp.take(feat_embed_tbl, fid, axis=0)    # embedding lookups (glue)
    s_embed = jnp.take(sent_embed_tbl, sid, axis=0)
    u_embed = jnp.take(user_embed_tbl, uid, axis=0)
    i_embed = jnp.take(item_embed_tbl, iid, axis=0)

    # raw embeddings in node order [features, sentences, users, items]; all
    # type-specific projections happen inside the fused kernel.
    x_embed = jnp.concatenate([f_embed, s_embed, u_embed, i_embed], axis=0)    # (N, H)

    result = graphx_forward(x_embed, adj, wslab, wtall, (Nf, Ns, Nu, Ni))      # (Ns, 2)

    result = jax.block_until_ready(result)
    assert result.shape == (Ns, 2) and result.dtype == jnp.float32
    assert bool(jnp.all(jnp.isfinite(result)))
    print("KERNEL_OK")
</pallas_src>

<mosaic_0001>
module attributes {stable_mosaic.version = 11 : i64} {
  func.func @_fused_kernel(%arg0: memref<16x32xf32, #tpu.memory_space<vmem>>, %arg1: memref<16x16xf32, #tpu.memory_space<vmem>>, %arg2: memref<33x448xf32, #tpu.memory_space<vmem>>, %arg3: memref<128x160xf32, #tpu.memory_space<vmem>>, %arg4: memref<8x128xf32, #tpu.memory_space<vmem>>) attributes {dimension_semantics = [], scalar_prefetch = 0 : i64, scratch_operands = 0 : i64, tpu.core_type = #tpu.core_type<tc>} {
    %c0 = arith.constant 0 : index
    %c0_0 = arith.constant 0 : index
    %0 = vector.load %arg0[%c0, %c0_0] : memref<16x32xf32, #tpu.memory_space<vmem>>, vector<16x32xf32>
    %c0_1 = arith.constant 0 : index
    %c0_2 = arith.constant 0 : index
    %1 = vector.load %arg2[%c0_1, %c0_2] : memref<33x448xf32, #tpu.memory_space<vmem>>, vector<32x96xf32>
    %cst = arith.constant dense<0.000000e+00> : vector<16x96xf32>
    %2 = tpu.matmul %0, %1, %cst {dimension_numbers = #tpu.dot_dimension_numbers<[1], [0], [0], [1], [0, 0, 1, 1], [], []>} : vector<16x32xf32>, vector<32x96xf32>, vector<16x96xf32> -> vector<16x96xf32>
    %c32 = arith.constant 32 : index
    %c0_3 = arith.constant 0 : index
    %3 = vector.load %arg2[%c32, %c0_3] : memref<33x448xf32, #tpu.memory_space<vmem>>, vector<1x96xf32>
    %4 = vector.broadcast %3 : vector<1x96xf32> to vector<16x96xf32>
    %5 = arith.addf %2, %4 : vector<16x96xf32>
    %6 = tpu.iota {dimensions = array<i32: 0>} : vector<16x1xi32>
    %c4_i32 = arith.constant 4 : i32
    %7 = vector.broadcast %c4_i32 : i32 to vector<16x1xi32>
    %8 = arith.cmpi slt, %6, %7 : vector<16x1xi32>
    %c12_i32 = arith.constant 12 : i32
    %9 = vector.broadcast %c12_i32 : i32 to vector<16x1xi32>
    %10 = arith.cmpi slt, %6, %9 : vector<16x1xi32>
    %11 = vector.extract_strided_slice %5 {offsets = [0, 0], sizes = [16, 32], strides = [1, 1]} : vector<16x96xf32> to vector<16x32xf32>
    %c14_i32 = arith.constant 14 : i32
    %12 = vector.broadcast %c14_i32 : i32 to vector<16x1xi32>
    %13 = arith.cmpi slt, %6, %12 : vector<16x1xi32>
    %14 = vector.extract_strided_slice %5 {offsets = [0, 32], sizes = [16, 32], strides = [1, 1]} : vector<16x96xf32> to vector<16x32xf32>
    %15 = vector.extract_strided_slice %5 {offsets = [0, 64], sizes = [16, 32], strides = [1, 1]} : vector<16x96xf32> to vector<16x32xf32>
    %16 = vector.shape_cast %13 : vector<16x1xi1> to vector<16x1xi1>
    %17 = vector.broadcast %16 : vector<16x1xi1> to vector<16x32xi1>
    %18 = arith.select %17, %14, %15 : vector<16x32xi1>, vector<16x32xf32>
    %19 = vector.shape_cast %10 : vector<16x1xi1> to vector<16x1xi1>
    %20 = vector.broadcast %19 : vector<16x1xi1> to vector<16x32xi1>
    %21 = arith.select %20, %11, %18 : vector<16x32xi1>, vector<16x32xf32>
    %22 = vector.shape_cast %8 : vector<16x1xi1> to vector<16x1xi1>
    %23 = vector.broadcast %22 : vector<16x1xi1> to vector<16x32xi1>
    %24 = arith.select %23, %0, %21 : vector<16x32xi1>, vector<16x32xf32>
    %c0_4 = arith.constant 0 : index
    %c128 = arith.constant 128 : index
    %25 = vector.load %arg2[%c0_4, %c128] : memref<33x448xf32, #tpu.memory_space<vmem>>, vector<32x8xf32>
    %cst_5 = arith.constant dense<0.000000e+00> : vector<16x8xf32>
    %26 = tpu.matmul %24, %25, %cst_5 {dimension_numbers = #tpu.dot_dimension_numbers<[1], [0], [0], [1], [0, 0, 1, 1], [], []>} : vector<16x32xf32>, vector<32x8xf32>, vector<16x8xf32> -> vector<16x8xf32>
    %27 = vector.extract_strided_slice %26 {offsets = [4, 0], sizes = [8, 4], strides = [1, 1]} : vector<16x8xf32> to vector<8x4xf32>
    %28 = vector.extract_strided_slice %26 {offsets = [0, 4], sizes = [16, 4], strides = [1, 1]} : vector<16x8xf32> to vector<16x4xf32>
    %29 = vector.extract_strided_slice %27 {offsets = [0, 0], sizes = [8, 1], strides = [1, 1]} : vector<8x4xf32> to vector<8x1xf32>
    %30 = vector.extract_strided_slice %27 {offsets = [0, 1], sizes = [8, 1], strides = [1, 1]} : vector<8x4xf32> to vector<8x1xf32>
    %31 = vector.extract_strided_slice %27 {offsets = [0, 2], sizes = [8, 1], strides = [1, 1]} : vector<8x4xf32> to vector<8x1xf32>
    %32 = vector.extract_strided_slice %27 {offsets = [0, 3], sizes = [8, 1], strides = [1, 1]} : vector<8x4xf32> to vector<8x1xf32>
    %33 = tpu.concatenate %29, %30, %31, %32 in 0 : vector<8x1xf32>, vector<8x1xf32>, vector<8x1xf32>, vector<8x1xf32> -> vector<32x1xf32>
    %34 = vector.extract_strided_slice %28 {offsets = [0, 0], sizes = [16, 1], strides = [1, 1]} : vector<16x4xf32> to vector<16x1xf32>
    %35 = tpu.transpose %34, [1, 0] : vector<16x1xf32> -> vector<1x16xf32>
    %36 = vector.shape_cast %35 : vector<1x16xf32> to vector<1x16xf32>
    %37 = vector.broadcast %36 : vector<1x16xf32> to vector<8x16xf32>
    %38 = vector.extract_strided_slice %28 {offsets = [0, 1], sizes = [16, 1], strides = [1, 1]} : vector<16x4xf32> to vector<16x1xf32>
    %39 = tpu.transpose %38, [1, 0] : vector<16x1xf32> -> vector<1x16xf32>
    %40 = vector.shape_cast %39 : vector<1x16xf32> to vector<1x16xf32>
    %41 = vector.broadcast %40 : vector<1x16xf32> to vector<8x16xf32>
    %42 = vector.extract_strided_slice %28 {offsets = [0, 2], sizes = [16, 1], strides = [1, 1]} : vector<16x4xf32> to vector<16x1xf32>
    %43 = tpu.transpose %42, [1, 0] : vector<16x1xf32> -> vector<1x16xf32>
    %44 = vector.shape_cast %43 : vector<1x16xf32> to vector<1x16xf32>
    %45 = vector.broadcast %44 : vector<1x16xf32> to vector<8x16xf32>
    %46 = vector.extract_strided_slice %28 {offsets = [0, 3], sizes = [16, 1], strides = [1, 1]} : vector<16x4xf32> to vector<16x1xf32>
    %47 = tpu.transpose %46, [1, 0] : vector<16x1xf32> -> vector<1x16xf32>
    %48 = vector.shape_cast %47 : vector<1x16xf32> to vector<1x16xf32>
    %49 = vector.broadcast %48 : vector<1x16xf32> to vector<8x16xf32>
    %50 = tpu.concatenate %37, %41, %45, %49 in 0 : vector<8x16xf32>, vector<8x16xf32>, vector<8x16xf32>, vector<8x16xf32> -> vector<32x16xf32>
    %c4 = arith.constant 4 : index
    %c0_6 = arith.constant 0 : index
    %51 = vector.load %arg1[%c4, %c0_6] : memref<16x16xf32, #tpu.memory_space<vmem>>, vector<8x16xf32>
    %52 = tpu.concatenate %51, %51, %51, %51 in 0 : vector<8x16xf32>, vector<8x16xf32>, vector<8x16xf32>, vector<8x16xf32> -> vector<32x16xf32>
    %53 = vector.broadcast %33 : vector<32x1xf32> to vector<32x16xf32>
    %54 = arith.addf %53, %50 : vector<32x16xf32>
    %cst_7 = arith.constant 0.000000e+00 : f32
    %55 = vector.broadcast %cst_7 : f32 to vector<32x16xf32>
    %56 = arith.cmpf ogt, %54, %55 : vector<32x16xf32>
    %cst_8 = arith.constant 2.000000e-01 : f32
    %57 = vector.broadcast %cst_8 : f32 to vector<32x16xf32>
    %58 = arith.mulf %57, %54 : vector<32x16xf32>
    %59 = arith.select %56, %54, %58 : vector<32x16xi1>, vector<32x16xf32>
    %cst_9 = arith.constant 0.000000e+00 : f32
    %60 = vector.broadcast %cst_9 : f32 to vector<32x16xf32>
    %61 = arith.cmpf ogt, %52, %60 : vector<32x16xf32>
    %62 = arith.mulf %59, %52 : vector<32x16xf32>
    %cst_10 = arith.constant -1.000000e+30 : f32
    %63 = vector.broadcast %cst_10 : f32 to vector<32x16xf32>
    %64 = arith.select %61, %62, %63 : vector<32x16xi1>, vector<32x16xf32>
    %cst_11 = arith.constant dense<0xFF800000> : vector<32xf32>
    %65 = vector.multi_reduction <maximumf>, %64, %cst_11 [1] : vector<32x16xf32> to vector<32xf32>
    %66 = vector.shape_cast %65 : vector<32xf32> to vector<32x1xf32>
    %67 = vector.broadcast %66 : vector<32x1xf32> to vector<32x16xf32>
    %68 = arith.subf %64, %67 : vector<32x16xf32>
    %69 = math.exp %68 : vector<32x16xf32>
    %cst_12 = arith.constant dense<0.000000e+00> : vector<32xf32>
    %70 = vector.multi_reduction <add>, %69, %cst_12 [1] : vector<32x16xf32> to vector<32xf32>
    %71 = vector.shape_cast %70 : vector<32xf32> to vector<32x1xf32>
    %cst_13 = arith.constant -1.000000e+29 : f32
    %72 = vector.broadcast %cst_13 : f32 to vector<32x1xf32>
    %73 = arith.cmpf ogt, %66, %72 : vector<32x1xf32>
    %74 = tpu.reciprocal %71 {approx = true} : vector<32x1xf32> -> vector<32x1xf32>
    %cst_14 = arith.constant 0.000000e+00 : f32
    %75 = vector.broadcast %cst_14 : f32 to vector<32x1xf32>
    %76 = arith.select %73, %74, %75 : vector<32x1xi1>, vector<32x1xf32>
    %77 = vector.broadcast %76 : vector<32x1xf32> to vector<32x16xf32>
    %78 = arith.mulf %69, %77 : vector<32x16xf32>
    %cst_15 = arith.constant dense<0.000000e+00> : vector<32x32xf32>
    %79 = tpu.matmul %78, %24, %cst_15 {dimension_numbers = #tpu.dot_dimension_numbers<[1], [0], [0], [1], [0, 0, 1, 1], [], []>} : vector<32x16xf32>, vector<16x32xf32>, vector<32x32xf32> -> vector<32x32xf32>
    %80 = vector.extract_strided_slice %79 {offsets = [0, 0], sizes = [8, 32], strides = [1, 1]} : vector<32x32xf32> to vector<8x32xf32>
    %81 = vector.extract_strided_slice %79 {offsets = [8, 0], sizes = [8, 32], strides = [1, 1]} : vector<32x32xf32> to vector<8x32xf32>
    %82 = vector.extract_strided_slice %79 {offsets = [16, 0], sizes = [8, 32], strides = [1, 1]} : vector<32x32xf32> to vector<8x32xf32>
    %83 = vector.extract_strided_slice %79 {offsets = [24, 0], sizes = [8, 32], strides = [1, 1]} : vector<32x32xf32> to vector<8x32xf32>
    %84 = tpu.concatenate %80, %81, %82, %83 in 1 : vector<8x32xf32>, vector<8x32xf32>, vector<8x32xf32>, vector<8x32xf32> -> vector<8x128xf32>
    %c0_16 = arith.constant 0 : index
    %c128_17 = arith.constant 128 : index
    %85 = vector.load %arg3[%c0_16, %c128_17] : memref<128x160xf32, #tpu.memory_space<vmem>>, vector<128x32xf32>
    %cst_18 = arith.constant dense<0.000000e+00> : vector<8x32xf32>
    %86 = tpu.matmul %84, %85, %cst_18 {dimension_numbers = #tpu.dot_dimension_numbers<[1], [0], [0], [1], [0, 0, 1, 1], [], []>} : vector<8x128xf32>, vector<128x32xf32>, vector<8x32xf32> -> vector<8x32xf32>
    %87 = vector.extract_strided_slice %24 {offsets = [4, 0], sizes = [8, 32], strides = [1, 1]} : vector<16x32xf32> to vector<8x32xf32>
    %88 = arith.addf %87, %86 : vector<8x32xf32>
    %c0_19 = arith.constant 0 : index
    %c256 = arith.constant 256 : index
    %89 = vector.load %arg2[%c0_19, %c256] : memref<33x448xf32, #tpu.memory_space<vmem>>, vector<32x192xf32>
    %cst_20 = arith.constant dense<0.000000e+00> : vector<8x192xf32>
    %90 = tpu.matmul %88, %89, %cst_20 {dimension_numbers = #tpu.dot_dimension_numbers<[1], [0], [0], [1], [0, 0, 1, 1], [], []>} : vector<8x32xf32>, vector<32x192xf32>, vector<8x192xf32> -> vector<8x192xf32>
    %c32_21 = arith.constant 32 : index
    %c256_22 = arith.constant 256 : index
    %91 = vector.load %arg2[%c32_21, %c256_22] : memref<33x448xf32, #tpu.memory_space<vmem>>, vector<1x192xf32>
    %92 = vector.broadcast %91 : vector<1x192xf32> to vector<8x192xf32>
    %93 = arith.addf %90, %92 : vector<8x192xf32>
    %94 = vector.extract_strided_slice %93 {offsets = [0, 0], sizes = [8, 64], strides = [1, 1]} : vector<8x192xf32> to vector<8x64xf32>
    %cst_23 = arith.constant 0.000000e+00 : f32
    %95 = vector.broadcast %cst_23 : f32 to vector<8x64xf32>
    %96 = arith.maximumf %94, %95 : vector<8x64xf32>
    %97 = vector.extract_strided_slice %93 {offsets = [0, 64], sizes = [8, 128], strides = [1, 1]} : vector<8x192xf32> to vector<8x128xf32>
    %c0_24 = arith.constant 0 : index
    %c0_25 = arith.constant 0 : index
    %98 = vector.load %arg3[%c0_24, %c0_25] : memref<128x160xf32, #tpu.memory_space<vmem>>, vector<64x128xf32>
    %cst_26 = arith.constant dense<0.000000e+00> : vector<8x128xf32>
    %99 = tpu.matmul %96, %98, %cst_26 {dimension_numbers = #tpu.dot_dimension_numbers<[1], [0], [0], [1], [0, 0, 1, 1], [], []>} : vector<8x64xf32>, vector<64x128xf32>, vector<8x128xf32> -> vector<8x128xf32>
    %100 = arith.addf %97, %99 : vector<8x128xf32>
    %c0_27 = arith.constant 0 : index
    %c0_28 = arith.constant 0 : index
    %101 = vector.load %arg4[%c0_27, %c0_28] : memref<8x128xf32, #tpu.memory_space<vmem>>, vector<8x128xf32>
    tpu.vector_store %arg4[%c0_27, %c0_28], %100 {strides = array<i32>} : memref<8x128xf32, #tpu.memory_space<vmem>>, vector<8x128xf32>,
    return
  }
}

</mosaic_0001>

<bundles_post_ra>
// kernel: tpu_custom_call.1
= control target key start
LH: loop header
LB: loop body
LE: loop exit
PB: predicated region body
PF: predicated region fallthrough
CT: control target
= control target key end

     0   :  { %vm25_vm0 = vcmask 261120   ;;  %s1445_s0 = inlined_call_operand.vmem [shape: f32[16,32], index: 0, kind: input, shape index: {}]   ;;  %s1446_s1 = inlined_call_operand.vmem [shape: f32[16,16], index: 1, kind: input, shape index: {}]   ;;  %s1447_s2 = inlined_call_operand.vmem [shape: f32[33,448], index: 2, kind: input, shape index: {}]   ;;  %s1448_s3 = inlined_call_operand.vmem [shape: f32[128,160], index: 3, kind: input, shape index: {}]   ;;  %s1449_s4 = inlined_call_operand.hbm [shape: f32[8,128], index: 4, kind: output, shape index: {}]  }
   0x1   :  { %v20_v0 = vld [vmem:[%s1447_s2] sm:$0xff] }
   0x2   :  { %v21_v1 = vld [vmem:[%s1447_s2 + $0x20] sm:$0xff] }
   0x3   :  { %v22_v2 = vld [vmem:[%s1447_s2 + $0x40] sm:$0xff]  ;;  %v1066_v3 = vpack.c.bf16 %v21_v1, %v20_v0 }
   0x4   :  { %v23_v4 = vld [vmem:[%s1447_s2 + $0x60] sm:$0xff] }
   0x5   :  { %v18_v5 = vld [vmem:[%s1445_s0] sm:$0xff]  ;;  %v1070_v6 = vpack.c.bf16 %v23_v4, %v22_v2 }
   0x6   :  { %988 = vmatprep.mubr.msk.f32.mxu0 %vm25_vm0, %v18_v5 }
   0x7   :  { %9 = vsyncpa [#allocation3], 0  ;;  %1067 = vmatprep.subr.bf16.mxu0 %v1066_v3  ;;  %v19_v7 = vld [vmem:[%s1445_s0 + $0x8] sm:$0xff]  ;;  %v107_v13 = vlaneseq  ;;  %v24_v16 = vld [vmem:[%s1447_s2 + $0x80] ss:$0 sm:$0xff]  ;;  %s1187_s10 = smov 96  }
   0x8   :  { %1069 = vmatpush3.bf16.msra.mxu0 %v1066_v3  ;;  %v150_v8 = vld [vmem:[%s1447_s2 + $0x8] sm:$0xff]  ;;  %v1188_v28 = vmov 0   ;;  %vm237_vm4 = vcmask 1043456   ;;  %s1189_s11 = smov 125   ;;  %s1190_s12 = smov 127   ;;  %vm457_vm7 = vcmask 130048  }
   0x9   :  { %1071 = vmatprep.subr.bf16.mxu0 %v1070_v6  ;;  %v151_v9 = vld [vmem:[%s1447_s2 + $0x28] sm:$0xff]  ;;  %v1259_v15 = vshrl.u32 %v107_v13, 7  ;;  %1145 = vset.pattern.permute.xlu1 %v1188_v28  ;;  %s1191_s13 = smov 123   ;;  %s1192_s14 = smov 126   ;;  %vm1197_vm15 = vmmov 0  }
   0xa   :  { %v152_v10 = vld [vmem:[%s1447_s2 + $0x48] sm:$0xff]  ;;  %v1074_v11 = vpack.c.bf16 %v151_v9, %v150_v8  ;;  %1146 = vset.pattern.permute.xlu0 %v1188_v28  ;;  %s1193_s15 = smov 124   ;;  %s1194_s16 = smov 121  }
   0xb   :  { %v153_v12 = vld [vmem:[%s1447_s2 + $0x68] sm:$0xff]  ;;  %vm110_vm1 = vcmp.lt.s32.totalorder %v1259_v15, 4  ;;  %v109_v22 = vadd.s32 8, %v1259_v15  ;;  %s1195_s17 = smov 122   ;;  %v1280_v46 = vsub.s32 0, %v1259_v15  ;;  %s1199_s28 = smov 32  }
   0xc   :  { %1073 = vmatpush3.bf16.msra.mxu0 %v1070_v6  ;;  %v1078_v14 = vpack.c.bf16 %v153_v12, %v152_v10  ;;  %1075 = vmatprep.subr.bf16.mxu1 %v1074_v11  ;;  %v415_v51 = vld [vmem:[%s1446_s1 + $0x4] sm:$0xff]  ;;  %s1200_s29 = smov 64  }
   0xd   :  { %1077 = vmatpush3.bf16.msra.mxu1 %v1074_v11  ;;  %vm115_vm2 = vcmp.lt.s32.totalorder %v109_v22, 14  ;;  %vm113_vm3 = vcmp.lt.s32.totalorder %v109_v22, 12  ;;  %vm448_vm6 = vcmp.gt.f32.partialorder %v415_v51, 0.0 }
   0xe   :  { %1079 = vmatprep.subr.bf16.mxu1 %v1078_v14 }
   0xf   :  { %989 = vmatmul.mubr.msk.f32.vlgmr.msra.gmra.mrb[0].mxu0 %vm25_vm0, %v19_v7 }
  0x11   :  { %1081 = vmatpush3.bf16.msra.mxu1 %v1078_v14 }
  0xe2   :  { %v990_v17 = vpop.f32.mrb[0].mxu0 }
  0xe3   :  { %v104_v18 = vadd.f32 %v990_v17, %v24_v16  ;;  %v98_v19 = vpop.f32.mrb[1].mxu0 }
  0xe4   :  { %v99_v20 = vadd.f32 %v98_v19, %v24_v16 }
  0xe5   :  { %124 = vrot.lane.b32.xlu0 %v104_v18, %s1187_s10 }
  0xe6   :  { %v1266_v21 = vsel %vm110_vm1, %v18_v5, %v99_v20  ;;  %vm620_vm1 = vcmask 523264  }
  0xe7   :  { %999 = vmatprep.mubr.msk.f32.mxu1 %vm25_vm0, %v1266_v21 }
 0x157   :  { %v125_v23 = vpop.permute.xlu0 %124 }
 0x158   :  { %v129_v24 = vsel %vm115_vm2, %v104_v18, %v125_v23  ;;  %vm622_vm2 = vcmask 785408  }
 0x159   :  { %138 = vrot.lane.b32.xlu0 %v129_v24, %s1187_s10 }
 0x1cb   :  { %v139_v25 = vpop.permute.xlu0 %138 }
 0x1cc   :  { %v1272_v26 = vsel %vm113_vm3, %v104_v18, %v139_v25 }
 0x1cd   :  { %1000 = vmatmul.mubr.msk.f32.vlgmr.msra.gmra.mrb[0].mxu1 %vm25_vm0, %v1272_v26  ;;  %v1082_v27 = vpack.c.bf16 %v1272_v26, %v1266_v21 }
 0x1cf   :  { %1083 = vmatprep.subr.bf16.mxu0 %v1082_v27 }
 0x1d0   :  { %1085 = vmatpush3.bf16.msra.mxu0 %v1082_v27 }
 0x2a0   :  { %v1001_v29 = vpop.f32.mrb[0].mxu1 }
 0x2a1   :  { %v226_v30 = vpop.f32.mrb[1].mxu1  ;;  %v239_v31 = vrot.slane %v1001_v29, 4 }
 0x2a2   :  { %v238_v32 = vrot.slane %v226_v30, 4 }
 0x2a4   :  { %v240_v33 = vsel %vm237_vm4, %v238_v32, %v239_v31 }
 0x2a5   :  { %245 = vrot.lane.b32.xlu0 %v240_v33, %s1189_s11  ;;  %241 = vrot.lane.b32.xlu1 %v240_v33, %s1190_s12 }
 0x2a9   :  { %289 = vrot.lane.b32.xlu0 %v226_v30, %s1191_s13  ;;  %243 = vrot.lane.b32.xlu1 %v240_v33, %s1192_s14 }
 0x2ad   :  { %291 = vrot.lane.b32.xlu0 %v1001_v29, %s1191_s13  ;;  %247 = vrot.lane.b32.xlu1 %v226_v30, %s1193_s15 }
 0x2b1   :  { %373 = vrot.lane.b32.xlu0 %v226_v30, %s1194_s16  ;;  %249 = vrot.lane.b32.xlu1 %v1001_v29, %s1193_s15 }
 0x2b5   :  { %375 = vrot.lane.b32.xlu0 %v1001_v29, %s1194_s16  ;;  %331 = vrot.lane.b32.xlu1 %v226_v30, %s1195_s17 }
 0x2b9   :  { %333 = vrot.lane.b32.xlu1 %v1001_v29, %s1195_s17 }
 0x2bd   :  { %417 = vperm.xlu1 %1145, %v240_v33  }
 0x317   :  { %v242_v34 = vpop.permute.xlu1 %241  ;;  %v246_v36 = vpop.permute.xlu0 %245 }
 0x318   :  { %421 = vperm.xlu0 %1146, %v242_v34  }
 0x31b   :  { %v244_v35 = vpop.permute.xlu1 %243  ;;  %v290_v39 = vpop.permute.xlu0 %289 }
 0x31c   :  { %425 = vperm.xlu1 %1145, %v244_v35  }
 0x31f   :  { %v248_v37 = vpop.permute.xlu1 %247  ;;  %v292_v41 = vpop.permute.xlu0 %291 }
 0x320   :  { %429 = vperm.xlu1 %1145, %v246_v36  }
 0x323   :  { %v250_v38 = vpop.permute.xlu1 %249  ;;  %v374_v43 = vpop.permute.xlu0 %373 }
 0x327   :  { %v332_v40 = vpop.permute.xlu1 %331  ;;  %v376_v44 = vpop.permute.xlu0 %375 }
 0x32b   :  { %v334_v42 = vpop.permute.xlu1 %333 }
 0x336   :  { %253 = vxpose.xlu0.b32.start [1/2] (short) (narrow) %v248_v37, 8 }
 0x33a   :  { %254 = vxpose.xlu0.b32.end [2/2] (short) (narrow) %v250_v38, 8 }
 0x33c   :  { %v418_v49 = vpop.permute.xlu1 %417 }
 0x33e   :  { %337 = vxpose.xlu0.b32.start [1/2] (short) (narrow) %v332_v40, 8 }
 0x342   :  { %338 = vxpose.xlu0.b32.end [2/2] (short) (narrow) %v334_v42, 8 }
 0x346   :  { %379 = vxpose.xlu0.b32.start [1/2] (short) (narrow) %v374_v43, 8 }
 0x349   :  { %295 = vxpose.xlu1.b32.start [1/2] (short) (narrow) %v290_v39, 8 }
 0x34a   :  { %380 = vxpose.xlu0.b32.end [2/2] (short) (narrow) %v376_v44, 8 }
 0x34d   :  { %296 = vxpose.xlu1.b32.end [2/2] (short) (narrow) %v292_v41, 8 }
 0x397   :  { %v422_v45 = vpop.permute.xlu0 %421 }
 0x39b   :  { %v426_v56 = vpop.permute.xlu1 %425 }
 0x39f   :  { %v430_v62 = vpop.permute.xlu1 %429 }
 0x3b6   :  { %v269_v47 = vpop.trf.xlu0 }
 0x3b7   :  { %v288_v48 = vrot.slane %v269_v47, %v1280_v46 }
 0x3b9   :  { %v432_v50 = vadd.f32 %v418_v49, %v288_v48 }
 0x3bb   :  { %v440_v52 = vmul.f32 0.2, %v432_v50  ;;  %vm436_vm5 = vcmp.gt.f32.partialorder %v432_v50, 0.0 }
 0x3bd   :  { %v444_v53 = vsel %vm436_vm5, %v432_v50, %v440_v52 }
 0x3be   :  { %v353_v54 = vpop.trf.xlu0  ;;  %v449_v55 = vmul.f32 %v444_v53, %v415_v51 }
 0x3bf   :  { %v372_v57 = vrot.slane %v353_v54, %v1280_v46 }
 0x3c0   :  { %v453_v58 = vsel %vm448_vm6, %v449_v55, -1e+30 }
 0x3c1   :  { %v434_v59 = vadd.f32 %v426_v56, %v372_v57  ;;  %v458_v60 = vsel %vm457_vm7, %v453_v58, -inf }
 0x3c2   :  { %459 = vmax.xlane.f32.xlu1 %v458_v60  ;;  %v625_v60 = vld [vmem:[%s1448_s3 + $0x18] sm:$0xff] }
 0x3c3   :  { %v442_v61 = vmul.f32 0.2, %v434_v59  ;;  %vm438_vm8 = vcmp.gt.f32.partialorder %v434_v59, 0.0 }
 0x3c5   :  { %v446_v63 = vsel %vm438_vm8, %v434_v59, %v442_v61  ;;  %v624_v59 = vld [vmem:[%s1448_s3 + $0x8] sm:$0xff] }
 0x3c6   :  { %v395_v0 = vpop.trf.xlu0  ;;  %v451_v1 = vmul.f32 %v446_v63, %v415_v51  ;;  %v626_v61 = vld [vmem:[%s1448_s3 + $0x28] sm:$0xff]  ;;  %v1087_v63 = vpack.c.bf16 %v625_v60, %v624_v59 }
 0x3c7   :  { %v414_v2 = vrot.slane %v395_v0, %v1280_v46  ;;  %v627_v0 = vld [vmem:[%s1448_s3 + $0x38] sm:$0xff] }
 0x3c8   :  { %v455_v3 = vsel %vm448_vm6, %v451_v1, -1e+30  ;;  %v1090_v1 = vpack.c.bf16 %v627_v0, %v626_v61  ;;  %v822_v0 = vld [vmem:[%s1448_s3 + $0x70] sm:$0xff] }
 0x3c9   :  { %v435_v4 = vadd.f32 %v430_v62, %v414_v2  ;;  %v311_v5 = vpop.trf.xlu1  ;;  %v464_v6 = vsel %vm457_vm7, %v455_v3, -inf  ;;  %v1196_v62 = vmov 0.0|0.0   ;;  %v628_v2 = vld [vmem:[%s1448_s3 + $0x48] sm:$0xff] }
 0x3ca   :  { %v330_v7 = vrot.slane %v311_v5, %v1280_v46  ;;  %465 = vmax.xlane.f32.xlu1 %v464_v6  ;;  %1086 = vmatprep.subr.bf16.mxu1 %v1196_v62  ;;  %v630_v5 = vld [vmem:[%s1448_s3 + $0x68] sm:$0xff]  ;;  %v631_v6 = vld [vmem:[%s1448_s3 + $0x78] sm:$0xff] }
 0x3cb   :  { %v443_v8 = vmul.f32 0.2, %v435_v4  ;;  %vm439_vm9 = vcmp.gt.f32.partialorder %v435_v4, 0.0  ;;  %1088 = vmatpush3.bf16.msra.mxu1 %v1087_v63  ;;  %v821_v63 = vld [vmem:[%s1448_s3 + $0x60] sm:$0xff] }
 0x3cc   :  { %v433_v9 = vadd.f32 %v422_v45, %v330_v7  ;;  %1089 = vmatprep.subr.bf16.mxu1 %v1196_v62  ;;  %v1096_v7 = vpack.c.bf16 %v631_v6, %v630_v5 }
 0x3cd   :  { %v447_v10 = vsel %vm439_vm9, %v435_v4, %v443_v8  ;;  %v632_v8 = vld [vmem:[%s1448_s3 + $0x88] sm:$0xff] }
 0x3ce   :  { %v441_v11 = vmul.f32 0.2, %v433_v9  ;;  %v452_v12 = vmul.f32 %v447_v10, %v415_v51  ;;  %vm437_vm10 = vcmp.gt.f32.partialorder %v433_v9, 0.0 }
 0x3cf   :  { %1091 = vmatpush3.bf16.msra.mxu1 %v1090_v1  ;;  %v1128_v1 = vpack.c.bf16 %v822_v0, %v821_v63 }
 0x3d0   :  { %v456_v13 = vsel %vm448_vm6, %v452_v12, -1e+30  ;;  %v445_v14 = vsel %vm437_vm10, %v433_v9, %v441_v11  ;;  %1092 = vmatprep.subr.bf16.mxu1 %v1196_v62  ;;  %v633_v9 = vld [vmem:[%s1448_s3 + $0x98] sm:$0xff]  ;;  %v634_v11 = vld [vmem:[%s1448_s3 + $0xa8] sm:$0xff] }
 0x3d1   :  { %v467_v16 = vsel %vm457_vm7, %v456_v13, -inf  ;;  %v450_v17 = vmul.f32 %v445_v14, %v415_v51  ;;  %v1099_v10 = vpack.c.bf16 %v633_v9, %v632_v8  ;;  %v635_v12 = vld [vmem:[%s1448_s3 + $0xb8] sm:$0xff]  ;;  %v636_v14 = vld [vmem:[%s1448_s3 + $0xc8] sm:$0xff]  ;;  %v732_v9 = vsub.s32 1, %v1259_v15 }
 0x3d2   :  { %468 = vmax.xlane.f32.xlu1 %v467_v16  ;;  %v637_v16 = vld [vmem:[%s1448_s3 + $0xd8] sm:$0xff] }
 0x3d3   :  { %v454_v18 = vsel %vm448_vm6, %v450_v17, -1e+30  ;;  %v1105_v17 = vpack.c.bf16 %v637_v16, %v636_v14 }
 0x3d4   :  { %v461_v19 = vsel %vm457_vm7, %v454_v18, -inf }
 0x3d5   :  { %462 = vmax.xlane.f32.xlu0 %v461_v19  ;;  %v639_v19 = vld [vmem:[%s1448_s3 + $0xf8] sm:$0xff] }
 0x44f   :  { %v460_v20 = vpop.xlane.xlu1 %459 }
 0x450   :  { %v470_v22 = vsub.f32 %v453_v58, %v460_v20  ;;  %vm494_vm11 = vcmp.gt.f32.partialorder %v460_v20, -1e+29 }
 0x452   :  { %v474_v23 = vmul.f32 1.442695, %v470_v22  ;;  %v1198_v22 = vmov 0.0  }
 0x453   :  { %1044 = vmatprep.mubr.msk.f32.mxu1 %vm1197_vm15, %v1198_v22 }
 0x454   :  { %1147 = vpow2.f32 %v474_v23  ;;  %v716_v23 = vld [vmem:[%s1447_s2 + $0x18] sm:$0xff] }
 0x457   :  { %v466_v24 = vpop.xlane.xlu1 %465 }
 0x458   :  { %v472_v25 = vsub.f32 %v455_v3, %v466_v24  ;;  %vm496_vm12 = vcmp.gt.f32.partialorder %v466_v24, -1e+29  ;;  %v629_v3 = vld [vmem:[%s1448_s3 + $0x58] sm:$0xff] }
 0x459   :  { %v1093_v4 = vpack.c.bf16 %v629_v3, %v628_v2  ;;  %v718_v24 = vld [vmem:[%s1447_s2 + $0x38] sm:$0xff] }
 0x45a   :  { %v478_v27 = vmul.f32 1.442695, %v472_v25  ;;  %v1110_v25 = vpack.c.bf16 %v718_v24, %v716_v23  ;;  %v933_v2 = vld [vmem:[%s1447_s2 + $0x90] ss:$8 sm:$0x3] }
 0x45b   :  { %1094 = vmatpush3.bf16.msra.mxu1 %v1093_v4  ;;  %v729_v3 = vrot.slane %v933_v2, %v1280_v46 }
 0x45c   :  { %1149 = vpow2.f32 %v478_v27  ;;  %1095 = vmatprep.subr.bf16.mxu1 %v1196_v62  ;;  %1111 = vmatprep.subr.bf16.mxu0 %v1110_v25 }
 0x45e   :  { %v1148_v28 = vpop.eup %1147 }
 0x45f   :  { %v469_v29 = vpop.xlane.xlu1 %468  ;;  %v482_v30 = vsel %vm457_vm7, %v1148_v28, 0.0  ;;  %1097 = vmatpush3.bf16.msra.mxu1 %v1096_v7 }
 0x460   :  { %483 = vadd.xlane.f32.xlu1 %v482_v30  ;;  %v473_v31 = vsub.f32 %v456_v13, %v469_v29  ;;  %vm497_vm14 = vcmp.gt.f32.partialorder %v469_v29, -1e+29  ;;  %1098 = vmatprep.subr.bf16.mxu1 %v1196_v62  ;;  %v1102_v13 = vpack.c.bf16 %v635_v12, %v634_v11 }
 0x462   :  { %v463_v32 = vpop.xlane.xlu0 %462  ;;  %v480_v34 = vmul.f32 1.442695, %v473_v31 }
 0x463   :  { %v471_v33 = vsub.f32 %v454_v18, %v463_v32  ;;  %vm495_vm13 = vcmp.gt.f32.partialorder %v463_v32, -1e+29  ;;  %1100 = vmatpush3.bf16.msra.mxu1 %v1099_v10  ;;  %v638_v18 = vld [vmem:[%s1448_s3 + $0xe8] sm:$0xff]  ;;  %v733_v10 = vrot.slane %v933_v2, %v732_v9 }
 0x464   :  { %1101 = vmatprep.subr.bf16.mxu1 %v1196_v62  ;;  %v1108_v20 = vpack.c.bf16 %v639_v19, %v638_v18 }
 0x465   :  { %v476_v35 = vmul.f32 1.442695, %v471_v33 }
 0x466   :  { %v1150_v36 = vpop.eup %1149 }
 0x467   :  { %1151 = vpow2.f32 %v476_v35  ;;  %v488_v37 = vsel %vm457_vm7, %v1150_v36, 0.0  ;;  %1103 = vmatpush3.bf16.msra.mxu1 %v1102_v13 }
 0x468   :  { %489 = vadd.xlane.f32.xlu1 %v488_v37  ;;  %1153 = vpow2.f32 %v480_v34  ;;  %1104 = vmatprep.subr.bf16.mxu1 %v1196_v62  ;;  %v715_v37 = vld [vmem:[%s1447_s2 + $0x10] sm:$0xff] }
 0x46b   :  { %1106 = vmatpush3.bf16.msra.mxu1 %v1105_v17 }
 0x46c   :  { %1107 = vmatprep.subr.bf16.mxu1 %v1196_v62 }
 0x46f   :  { %1109 = vmatpush3.bf16.msra.mxu1 %v1108_v20 }
 0x471   :  { %v1152_v38 = vpop.eup %1151 }
 0x472   :  { %v485_v39 = vsel %vm457_vm7, %v1152_v38, 0.0  ;;  %v1154_v40 = vpop.eup %1153 }
 0x473   :  { %486 = vadd.xlane.f32.xlu0 %v485_v39  ;;  %v491_v41 = vsel %vm457_vm7, %v1154_v40, 0.0 }
 0x477   :  { %492 = vadd.xlane.f32.xlu0 %v491_v41  ;;  %v722_v41 = vld [vmem:[%s1447_s2 + $0x78] sm:$0xff] }
 0x4ed   :  { %v484_v42 = vpop.xlane.xlu1 %483 }
 0x4ee   :  { %1155 = vrcp.f32 %v484_v42 }
 0x4f5   :  { %v490_v47 = vpop.xlane.xlu1 %489 }
 0x4f6   :  { %1157 = vrcp.f32 %v490_v47 }
 0x4f8   :  { %v1156_v43 = vpop.eup %1155 }
 0x4f9   :  { %v502_v44 = vsel %vm494_vm11, %v1156_v43, 0.0  ;;  %v719_v43 = vld [vmem:[%s1447_s2 + $0x50] sm:$0xff] }
 0x4fa   :  { %v506_v45 = vmul.f32 %v1148_v28, %v502_v44  ;;  %v721_v44 = vld [vmem:[%s1447_s2 + $0x70] sm:$0xff] }
 0x4fc   :  { %1006 = vmatprep.mubr.msk.f32.mxu0 %vm457_vm7, %v506_v45  ;;  %v1116_v45 = vpack.c.bf16 %v721_v44, %v719_v43 }
 0x500   :  { %v487_v48 = vpop.xlane.xlu0 %486  ;;  %v1158_v50 = vpop.eup %1157 }
 0x501   :  { %1159 = vrcp.f32 %v487_v48  ;;  %v504_v52 = vsel %vm496_vm12, %v1158_v50, 0.0  ;;  %v815_v50 = vld [vmem:[%s1448_s3] sm:$0xff] }
 0x502   :  { %v508_v55 = vmul.f32 %v1150_v36, %v504_v52 }
 0x504   :  { %v493_v49 = vpop.xlane.xlu0 %492 }
 0x505   :  { %1161 = vrcp.f32 %v493_v49 }
 0x50b   :  { %v1160_v51 = vpop.eup %1159 }
 0x50c   :  { %v503_v53 = vsel %vm495_vm13, %v1160_v51, 0.0  ;;  %v816_v51 = vld [vmem:[%s1448_s3 + $0x10] sm:$0xff] }
 0x50d   :  { %v507_v54 = vmul.f32 %v1152_v38, %v503_v53  ;;  %v717_v38 = vld [vmem:[%s1447_s2 + $0x30] sm:$0xff] }
 0x50e   :  { %v1112_v39 = vpack.c.bf16 %v717_v38, %v715_v37 }
 0x50f   :  { %v1162_v56 = vpop.eup %1161  ;;  %1007 = vmatmul.mubr.msk.f32.vlgmr.msra.gmra.mrb[2].mxu0 %vm457_vm7, %v507_v54 }
 0x510   :  { %1009 = vmatprep.mubr.msk.f32.mxu0 %vm457_vm7, %v508_v55  ;;  %v505_v57 = vsel %vm497_vm14, %v1162_v56, 0.0  ;;  %1113 = vmatpush1.bf16.msra.mxu0 %v1112_v39  ;;  %v1119_v56 = vpack.c.bf16 %v816_v51, %v815_v50 }
 0x511   :  { %v509_v58 = vmul.f32 %v1154_v40, %v505_v57  ;;  %v720_v40 = vld [vmem:[%s1447_s2 + $0x58] sm:$0xff]  ;;  %v817_v57 = vld [vmem:[%s1448_s3 + $0x20] sm:$0xff]  ;;  %s1201_s2 = smov [#allocation2]  }
 0x512   :  { %v1114_v42 = vpack.c.bf16 %v722_v41, %v720_v40 }
 0x513   :  { %1010 = vmatmul.mubr.msk.f32.gmra.mrb[4].mxu0 %vm457_vm7, %v509_v58  ;;  %v818_v58 = vld [vmem:[%s1448_s3 + $0x30] sm:$0xff] }
 0x514   :  { %807 = vmatprep.mubr.f32.mxu0 %v1198_v22  ;;  %1115 = vmatprep.subr.bf16.mxu0 %v1114_v42  ;;  %v1122_v60 = vpack.c.bf16 %v818_v58, %v817_v57 }
 0x515   :  { %1117 = vmatpush1.bf16.msra.mxu0 %v1116_v45 }
 0x516   :  { %1118 = vmatprep.subr.bf16.mxu0 %v1196_v62 }
 0x5e2   :  { %v1008_v27 = vpop.f32.mrb[2].mxu0 }
 0x5e3   :  { %608 = vrot.lane.b32.xlu1 %v1008_v27, %s1199_s28  ;;  %v588_v28 = vpop.f32.mrb[3].mxu0 }
 0x5e6   :  { %v1011_v29 = vpop.f32.mrb[4].mxu0 }
 0x5e7   :  { %616 = vrot.lane.b32.xlu1 %v1011_v29, %s1187_s10  ;;  %v598_v30 = vpop.f32.mrb[5].mxu0 }
 0x5e8   :  { %612 = vrot.lane.b32.xlu0 %v598_v30, %s1200_s29 }
 0x655   :  { %v609_v31 = vpop.permute.xlu1 %608 }
 0x656   :  { %v619_v32 = vsel %vm25_vm0, %v588_v28, %v609_v31 }
 0x659   :  { %v617_v34 = vpop.permute.xlu1 %616 }
 0x65a   :  { %v613_v33 = vpop.permute.xlu0 %612 }
 0x65b   :  { %v621_v35 = vsel %vm620_vm1, %v619_v32, %v613_v33 }
 0x65c   :  { %v623_v36 = vsel %vm622_vm2, %v621_v35, %v617_v34 }
 0x65d   :  { %1045 = vmatmul.mubr.f32.vlgmr.msra.gmra.mrb[2].mxu1 %v623_v36 }
 0x730   :  { %v706_v47 = vpop.f32.mrb[2].mxu1 }
 0x731   :  { %v711_v48 = vrot.slane %v706_v47, 4  ;;  %v1046_v49 = vpop.f32.mrb[3].mxu1 }
 0x733   :  { %v713_v52 = vadd.f32 %v711_v48, %v1266_v21  ;;  %v714_v53 = vadd.f32 %v711_v48, %v1272_v26  ;;  %v819_v21 = vld [vmem:[%s1448_s3 + $0x40] sm:$0xff]  ;;  %v820_v26 = vld [vmem:[%s1448_s3 + $0x50] sm:$0xff]  ;;  %s917_s3 = sshll.u32 %s1201_s2, 4  ;;  %s918_s3 = int_to_ptr.vmem [resolvable:$true] %s917_s3 }
 0x734   :  { %v1125_v61 = vpack.c.bf16 %v820_v26, %v819_v21  ;;  %s1163_s6 = scalar_lea.vmem %s918_s3, 128  ;;  %p1168_p1 = scmp.lt.s32.totalorder %s918_s3, %s918_s3 }
 0x735   :  { %v738_v54 = vrot.slane %v713_v52, 4  ;;  %v739_v55 = vrot.slane %v714_v53, 4  ;;  %p1164_p0 = scmp.ne.s32.totalorder %s918_s3, %s1163_s6  ;;  %p1169_p2 = scmp.lt.s32.totalorder %s1163_s6, %s1163_s6 }
 0x737   :  { %v740_v59 = vsel %vm237_vm4, %v738_v54, %v739_v55  ;;  %p1170_p3 = por %p1169_p2, %p1168_p1 }
 0x738   :  { %934 = vmatmul.mubr.msk.f32.vlgmr.msra.gmra.mrb[6].mxu0 %vm25_vm0, %v740_v59 }
 0x739   :  { %1120 = vmatpush3.bf16.msra.mxu0 %v1119_v56  ;;  %1063 = vmatprep.mubr.msk.f32.mxu0 %vm1197_vm15, %v1198_v22  ;;  %p1171_p4 = pnand %p1170_p3, %p1164_p0 }
 0x73a   :  { %1121 = vmatprep.subr.bf16.mxu0 %v1196_v62 }
 0x73d   :  { %1123 = vmatpush3.bf16.msra.mxu0 %v1122_v60 }
 0x73e   :  { %1124 = vmatprep.subr.bf16.mxu0 %v1196_v62 }
 0x741   :  { %1126 = vmatpush3.bf16.msra.mxu0 %v1125_v61 }
 0x742   :  { %1127 = vmatprep.subr.bf16.mxu0 %v1196_v62 }
 0x745   :  { %1129 = vmatpush3.bf16.msra.mxu0 %v1128_v1 }
 0x80b   :  { %v809_v4 = vpop.f32.mrb[6].mxu0 }
 0x80c   :  { %v810_v5 = vadd.f32 %v809_v4, %v729_v3  ;;  %v811_v6 = vpop.f32.mrb[7].mxu0 }
 0x80d   :  { %v812_v11 = vadd.f32 %v811_v6, %v733_v10 }
 0x80e   :  { %v814_v62 = vmax.f32 %v810_v5, 0.0 }
 0x810   :  { %1064 = vmatmul.mubr.msk.f32.vlgmr.msra.gmra.mrb[8].mxu0 %vm620_vm1, %v814_v62 }
 0x8e3   :  { %v892_v7 = vpop.f32.mrb[8].mxu0 }
 0x8e4   :  { %897 = vrot.lane.b32.xlu1 %v892_v7, %s1200_s29  ;;  %v1065_v8 = vpop.f32.mrb[9].mxu0 }
 0x956   :  { %v898_v12 = vpop.permute.xlu1 %897 }
 0x957   :  { %v900_v13 = vadd.f32 %v898_v12, %v810_v5  ;;  %v901_v14 = vadd.f32 %v898_v12, %v812_v11 }
 0x959   :  { %906 = vrot.lane.b32.xlu1 %v901_v14, %s1200_s29  ;;  %904 = vrot.lane.b32.xlu0 %v900_v13, %s1200_s29 }
 0x9cb   :  { %v907_v46 = vpop.permute.xlu1 %906  ;;  %v905_v16 = vpop.permute.xlu0 %904 }
 0x9cc   :  { %v908_v17 = vsel %vm620_vm1, %v905_v16, %v907_v46 }
 0x9cd   :  { %910 = vst [vmem:[#allocation2] sm:$0xff] %v908_v17 }
 0x9ce   :  { %1174 = shalt.err (!%p1171_p4)
}
 0x9cf   :  { %s1175_s0 = scalar_lea.hbm %s1449_s4, 128 }
 0x9d0   :  { %p1176_p5 = scmp.ne.s32.totalorder %s1449_s4, %s1175_s0  ;;  %p1179_p6 = scmp.lt.u32.totalorder %s1175_s0, %s1449_s4 }
 0x9d2   :  { %p1181_p7 = pnand %p1179_p6, %p1176_p5 }
 0x9d4   :  { %1184 = shalt.err (!%p1181_p7)
}
 0x9d5   :  { %920 = dma.vmem_to_hbm [thread:$0]  %s918_s3, 128, %s1449_s4, [#allocation3]  }
 0x9d6   :  { %1185 = dma.done.wait [#allocation3], 128  }
 0x9d7   :  { %1186 = vsyncadd [#allocation3], 4294967168 }
 0x9d8   :  { %924 = vsyncpa [#allocation3], 1 }

</bundles_post_ra>
